<compile_context>
chip_gen: v7x
topology: tpu7x:2x2x1
jax: 0.10.0
libtpu: 0.0.40
codegen_flags: <defaults>
</compile_context>

<pallas_src>
import math
import functools

import jax
import jax.numpy as jnp
from jax.experimental import pallas as pl
from jax.experimental.pallas import tpu as pltpu

EPS = 1e-5  # PyTorch LayerNorm default

MODALITIES = ("cnv_broad", "cnv_focal", "expression", "snv",
              "fusion_gene", "translocations")
MODALITY_DIM_KEY = {
    "cnv_broad": "cnv_broad_dim",
    "cnv_focal": "cnv_focal_dim",
    "expression": "expr_dim",
    "snv": "snv_dim",
    "fusion_gene": "fusion_dim",
    "translocations": "trans_dim",
}


# ---------------------------------------------------------------------------
# helpers
# ---------------------------------------------------------------------------
def _pick_tn(n):
    """Row tile: >=128 when N allows; otherwise keep an even >=2-step grid."""
    if n >= 256:
        return 128
    n8 = max(8, ((n + 7) // 8) * 8)
    if n8 >= 16 and n8 % 16 == 0:
        return n8 // 2          # 2-step grid -> both v7x TensorCores get work
    return n8


def _pad_rows(x, tn):
    n = x.shape[0]
    n_pad = ((n + tn - 1) // tn) * tn
    if n_pad != n:
        x = jnp.pad(x, ((0, n_pad - n),) + ((0, 0),) * (x.ndim - 1))
    return x


def _ln_rows(x, g, b):
    """LayerNorm over last axis with one-pass statistics (f32)."""
    mu = jnp.mean(x, axis=-1, keepdims=True)
    ms = jnp.mean(x * x, axis=-1, keepdims=True)
    return (x - mu) * jax.lax.rsqrt(ms - mu * mu + EPS) * g + b


# ---------------------------------------------------------------------------
# 1) ModalityAttentionEncoder kernel
# ---------------------------------------------------------------------------
def _encoder_kernel(x_ref, w1_ref, wv_ref, wo_ref, vec_ref, o_ref, *, compute_dtype):
    def mm(a, b):
        if compute_dtype != jnp.float32:
            a = a.astype(compute_dtype)
            b = b.astype(compute_dtype)
        return jnp.dot(a, b, preferred_element_type=jnp.float32)

    x = x_ref[...]                                   # (tn, d_in)
    vec = vec_ref[...]                               # (8, P) packed per-lane vectors
    b1, g1, be1 = vec[0:1], vec[1:2], vec[2:3]
    bv, bo = vec[3:4], vec[4:5]
    g2, be2 = vec[5:6], vec[6:7]

    # initial_proj: Linear -> LayerNorm -> ReLU -> Dropout(eval: identity)
    h = mm(x, w1_ref[...]) + b1
    h = _ln_rows(h, g1, be1)
    h = jnp.maximum(h, 0.0)

    # seq_len == 1 MultiheadAttention: softmax over a single key is exactly 1,
    # so the q/k/score path is the identity on V (removed -- bit-exact).
    v = mm(h, wv_ref[...]) + bv
    a = mm(v, wo_ref[...]) + bo

    o_ref[...] = _ln_rows(h + a, g2, be2).astype(o_ref.dtype)


def encoder_forward(x, p, *, compute_dtype=jnp.float32):
    n, d_in = x.shape
    pdim = p["w1"].shape[1]
    tn = _pick_tn(n)
    x_p = _pad_rows(x, tn)
    n_pad = x_p.shape[0]

    kernel = functools.partial(_encoder_kernel, compute_dtype=compute_dtype)
    out = pl.pallas_call(
        kernel,
        out_shape=jax.ShapeDtypeStruct((n_pad, pdim), jnp.float32),
        grid=(n_pad // tn,),
        in_specs=[
            pl.BlockSpec((tn, d_in), lambda i: (i, 0)),      # x (row tile)
            pl.BlockSpec((d_in, pdim), lambda i: (0, 0)),    # W1
            pl.BlockSpec((pdim, pdim), lambda i: (0, 0)),    # Wv
            pl.BlockSpec((pdim, pdim), lambda i: (0, 0)),    # Wo
            pl.BlockSpec((8, pdim), lambda i: (0, 0)),       # packed vectors
        ],
        out_specs=pl.BlockSpec((tn, pdim), lambda i: (i, 0)),
        compiler_params=pltpu.CompilerParams(dimension_semantics=("parallel",)),
    )(x_p, p["w1"], p["wv"], p["wo"], p["vecs"])
    return out[:n]


# ---------------------------------------------------------------------------
# 2) CrossModalAttention kernel (real MHA over the modality axis, seq_len = M)
# ---------------------------------------------------------------------------
def _cross_attn_kernel(x_ref, wq_ref, wk_ref, wv_ref, wo_ref, vec_ref, o_ref,
                       *, num_heads):
    x = x_ref[0]                                     # (M, P)
    vec = vec_ref[...]
    bq, bk, bv = vec[0:1], vec[1:2], vec[2:3]
    bo, g, be = vec[3:4], vec[4:5], vec[5:6]

    pdim = x.shape[-1]
    hd = pdim // num_heads
    scale = 1.0 / math.sqrt(hd)

    q = jnp.dot(x, wq_ref[...], preferred_element_type=jnp.float32) + bq
    k = jnp.dot(x, wk_ref[...], preferred_element_type=jnp.float32) + bk
    v = jnp.dot(x, wv_ref[...], preferred_element_type=jnp.float32) + bv

    attn = jnp.zeros_like(x)
    for h in range(num_heads):                       # static, unrolled head loop
        lo = h * hd
        qh = q[:, lo:lo + hd]
        kh = k[:, lo:lo + hd]
        vh = v[:, lo:lo + hd]
        s = jnp.einsum("qd,kd->qk", qh, kh,
                       preferred_element_type=jnp.float32) * scale
        s = s - jnp.max(s, axis=-1, keepdims=True)
        e = jnp.exp(s)
        p = e / jnp.sum(e, axis=-1, keepdims=True)
        oh = jnp.dot(p, vh, preferred_element_type=jnp.float32)          # (M, hd)
        # concat-of-heads @ Wo  ==  sum_h  head_h @ Wo[h*hd:(h+1)*hd, :]
        attn = attn + jnp.dot(oh, wo_ref[lo:lo + hd, :],
                              preferred_element_type=jnp.float32)

    out = x + attn + bo                              # residual (dropout = identity)
    o_ref[0] = _ln_rows(out, g, be).astype(o_ref.dtype)


def cross_modal_attention(x, p, *, num_heads):
    b, m, pdim = x.shape
    kernel = functools.partial(_cross_attn_kernel, num_heads=num_heads)
    return pl.pallas_call(
        kernel,
        out_shape=jax.ShapeDtypeStruct((b, m, pdim), jnp.float32),
        grid=(b,),
        in_specs=[
            pl.BlockSpec((1, m, pdim), lambda i: (i, 0, 0)),
            pl.BlockSpec((pdim, pdim), lambda i: (0, 0)),
            pl.BlockSpec((pdim, pdim), lambda i: (0, 0)),
            pl.BlockSpec((pdim, pdim), lambda i: (0, 0)),
            pl.BlockSpec((pdim, pdim), lambda i: (0, 0)),
            pl.BlockSpec((8, pdim), lambda i: (0, 0)),
        ],
        out_specs=pl.BlockSpec((1, m, pdim), lambda i: (i, 0, 0)),
        compiler_params=pltpu.CompilerParams(dimension_semantics=("parallel",)),
    )(x, p["wq"], p["wk"], p["wv"], p["wo"], p["vecs"])


# ---------------------------------------------------------------------------
# 3) unify head kernel: Linear -> ReLU -> Dropout(identity) -> Linear -> LayerNorm
# ---------------------------------------------------------------------------
def _unify_kernel(x_ref, w1_ref, b1_ref, w2_ref, b2_ref, g_ref, be_ref, o_ref):
    x = x_ref[...]
    h = jnp.dot(x, w1_ref[...], preferred_element_type=jnp.float32) + b1_ref[...]
    h = jnp.maximum(h, 0.0)
    h = jnp.dot(h, w2_ref[...], preferred_element_type=jnp.float32) + b2_ref[...]
    o_ref[...] = _ln_rows(h, g_ref[...], be_ref[...]).astype(o_ref.dtype)


def unify_forward(x, p):
    n, f = x.shape
    h2 = p["w1"].shape[1]
    e = p["w2"].shape[1]
    tn = _pick_tn(n)
    x_p = _pad_rows(x, tn)
    n_pad = x_p.shape[0]
    out = pl.pallas_call(
        _unify_kernel,
        out_shape=jax.ShapeDtypeStruct((n_pad, e), jnp.float32),
        grid=(n_pad // tn,),
        in_specs=[
            pl.BlockSpec((tn, f), lambda i: (i, 0)),
            pl.BlockSpec((f, h2), lambda i: (0, 0)),
            pl.BlockSpec((1, h2), lambda i: (0, 0)),
            pl.BlockSpec((h2, e), lambda i: (0, 0)),
            pl.BlockSpec((1, e), lambda i: (0, 0)),
            pl.BlockSpec((1, e), lambda i: (0, 0)),
            pl.BlockSpec((1, e), lambda i: (0, 0)),
        ],
        out_specs=pl.BlockSpec((tn, e), lambda i: (i, 0)),
        compiler_params=pltpu.CompilerParams(dimension_semantics=("parallel",)),
    )(x_p, p["w1"], p["b1"], p["w2"], p["b2"], p["g"], p["be"])
    return out[:n]


# ---------------------------------------------------------------------------
# full model forward (kernels)
# ---------------------------------------------------------------------------
def myeloma_forward(batch, params, *, num_heads, compute_dtype=jnp.float32):
    embs = [encoder_forward(batch[m], params["enc"][m], compute_dtype=compute_dtype)
            for m in MODALITIES]
    stacked = jnp.stack(embs, axis=1)                 # (B, M, d)  (batch-leading)
    cross = cross_modal_attention(stacked, params["cross"], num_heads=num_heads)
    flat = cross.reshape(cross.shape[0], -1)          # == transpose(0,1).reshape in torch
    return unify_forward(flat, params["unify"])


# ---------------------------------------------------------------------------
# parameters (weights stored pre-transposed as (in, out))
# ---------------------------------------------------------------------------
def _linear_init(key, fan_in, fan_out):
    s = 1.0 / math.sqrt(fan_in)
    kw, kb = jax.random.split(key)
    w = jax.random.uniform(kw, (fan_in, fan_out), jnp.float32, -s, s)
    b = jax.random.uniform(kb, (1, fan_out), jnp.float32, -s, s)
    return w, b


def _affine_init(key, dim):
    kg, kb = jax.random.split(key)
    g = jax.random.uniform(kg, (1, dim), jnp.float32, 0.8, 1.2)
    b = jax.random.uniform(kb, (1, dim), jnp.float32, -0.1, 0.1)
    return g, b


def init_encoder_params(key, d_in, pdim):
    ks = jax.random.split(key, 7)
    w1, b1 = _linear_init(ks[0], d_in, pdim)
    wq, bq = _linear_init(ks[1], pdim, pdim)
    wk, bk = _linear_init(ks[2], pdim, pdim)
    wv, bv = _linear_init(ks[3], pdim, pdim)
    wo, bo = _linear_init(ks[4], pdim, pdim)
    g1, be1 = _affine_init(ks[5], pdim)
    g2, be2 = _affine_init(ks[6], pdim)
    zero = jnp.zeros((1, pdim), jnp.float32)
    vecs = jnp.concatenate([b1, g1, be1, bv, bo, g2, be2, zero], axis=0)  # (8, P)
    return dict(w1=w1, b1=b1, g1=g1, be1=be1, wq=wq, bq=bq, wk=wk, bk=bk,
                wv=wv, bv=bv, wo=wo, bo=bo, g2=g2, be2=be2, vecs=vecs)


def init_cross_params(key, pdim):
    ks = jax.random.split(key, 5)
    wq, bq = _linear_init(ks[0], pdim, pdim)
    wk, bk = _linear_init(ks[1], pdim, pdim)
    wv, bv = _linear_init(ks[2], pdim, pdim)
    wo, bo = _linear_init(ks[3], pdim, pdim)
    g, be = _affine_init(ks[4], pdim)
    zero = jnp.zeros((1, pdim), jnp.float32)
    vecs = jnp.concatenate([bq, bk, bv, bo, g, be, zero, zero], axis=0)   # (8, P)
    return dict(wq=wq, bq=bq, wk=wk, bk=bk, wv=wv, bv=bv, wo=wo, bo=bo,
                g=g, be=be, vecs=vecs)


def init_unify_params(key, total_dim, emb_dim):
    ks = jax.random.split(key, 3)
    w1, b1 = _linear_init(ks[0], total_dim, 2 * emb_dim)
    w2, b2 = _linear_init(ks[1], 2 * emb_dim, emb_dim)
    g, be = _affine_init(ks[2], emb_dim)
    return dict(w1=w1, b1=b1, w2=w2, b2=b2, g=g, be=be)


def init_params(key, config):
    keys = jax.random.split(key, len(MODALITIES) + 2)
    enc = {m: init_encoder_params(keys[i], config[MODALITY_DIM_KEY[m]],
                                  config["attn_dim"])
           for i, m in enumerate(MODALITIES)}
    cross = init_cross_params(keys[-2], config["attn_dim"])
    unify = init_unify_params(keys[-1],
                              config["num_modalities"] * config["attn_dim"],
                              config["final_emb_dim"])
    return dict(enc=enc, cross=cross, unify=unify)


# ---------------------------------------------------------------------------
# pure-JAX reference of the PyTorch eval-mode forward (keeps the full q/k path)
# ---------------------------------------------------------------------------
def _ln_ref(x, g, b):
    mu = x.mean(-1, keepdims=True)
    var = ((x - mu) ** 2).mean(-1, keepdims=True)
    return (x - mu) / jnp.sqrt(var + EPS) * g + b


def ref_encoder(x, p, num_heads):
    h = _ln_ref(x @ p["w1"] + p["b1"], p["g1"], p["be1"])
    h = jnp.maximum(h, 0.0)
    q = h @ p["wq"] + p["bq"]
    k = h @ p["wk"] + p["bk"]
    v = h @ p["wv"] + p["bv"]
    n, pdim = h.shape
    hd = pdim // num_heads
    qh = q.reshape(n, num_heads, hd)
    kh = k.reshape(n, num_heads, hd)
    vh = v.reshape(n, num_heads, hd)
    s = jnp.einsum("nhd,nhd->nh", qh, kh) / math.sqrt(hd)
    w = jax.nn.softmax(s[..., None], axis=-1)[..., 0]        # seq_len 1 -> ones
    a = (w[..., None] * vh).reshape(n, pdim) @ p["wo"] + p["bo"]
    return _ln_ref(h + a, p["g2"], p["be2"])


def ref_cross_attn(x, p, num_heads):
    b, m, pdim = x.shape
    hd = pdim // num_heads
    q = x @ p["wq"] + p["bq"]
    k = x @ p["wk"] + p["bk"]
    v = x @ p["wv"] + p["bv"]
    qh = q.reshape(b, m, num_heads, hd)
    kh = k.reshape(b, m, num_heads, hd)
    vh = v.reshape(b, m, num_heads, hd)
    s = jnp.einsum("bqhd,bkhd->bhqk", qh, kh) / math.sqrt(hd)
    w = jax.nn.softmax(s, axis=-1)
    o = jnp.einsum("bhqk,bkhd->bqhd", w, vh).reshape(b, m, pdim)
    a = o @ p["wo"] + p["bo"]
    return _ln_ref(x + a, p["g"], p["be"])


def ref_unify(x, p):
    h = jnp.maximum(x @ p["w1"] + p["b1"], 0.0)
    h = h @ p["w2"] + p["b2"]
    return _ln_ref(h, p["g"], p["be"])


def ref_forward(batch, params, num_heads):
    embs = [ref_encoder(batch[m], params["enc"][m], num_heads) for m in MODALITIES]
    stacked = jnp.stack(embs, axis=1)
    cross = ref_cross_attn(stacked, params["cross"], num_heads)
    flat = cross.reshape(cross.shape[0], -1)
    return ref_unify(flat, params["unify"])


# ---------------------------------------------------------------------------
if __name__ == "__main__":
    key = jax.random.PRNGKey(0)
    k_params, k_data = jax.random.split(key)

    config = dict(
        cnv_broad_dim=32, cnv_focal_dim=48, expr_dim=256, snv_dim=64,
        fusion_dim=16, trans_dim=24,
        attn_dim=128, num_heads=4, dropout=0.2,
        num_modalities=6, final_emb_dim=128,
    )
    batch_size = 16

    params = init_params(k_params, config)

    data_keys = jax.random.split(k_data, len(MODALITIES))
    batch = {
        m: jax.random.normal(data_keys[i],
                             (batch_size, config[MODALITY_DIM_KEY[m]]),
                             jnp.float32)
        for i, m in enumerate(MODALITIES)
    }

    out = myeloma_forward(batch, params, num_heads=config["num_heads"])
    out = jax.block_until_ready(out)

    ref = ref_forward(batch, params, config["num_heads"])
    assert out.shape == (batch_size, config["final_emb_dim"])
    assert jnp.allclose(out, ref, atol=1e-2, rtol=1e-2), \
        float(jnp.max(jnp.abs(out - ref)))

    print("KERNEL_OK")
</pallas_src>

<mosaic_0001>
module attributes {stable_mosaic.version = 11 : i64} {
  func.func @_encoder_kernel(%arg0: i32, %arg1: memref<8x32xf32, #tpu.memory_space<vmem>>, %arg2: memref<32x128xf32, #tpu.memory_space<vmem>>, %arg3: memref<128x128xf32, #tpu.memory_space<vmem>>, %arg4: memref<128x128xf32, #tpu.memory_space<vmem>>, %arg5: memref<8x128xf32, #tpu.memory_space<vmem>>, %arg6: memref<8x128xf32, #tpu.memory_space<vmem>>) attributes {dimension_semantics = [#tpu.dimension_semantics<parallel>], iteration_bounds = array<i64: 2>, scalar_prefetch = 0 : i64, scratch_operands = 0 : i64, tpu.core_type = #tpu.core_type<tc>, window_params = [{transform_indices = @transform_0, window_bounds = array<i64: 8, 32>}, {pipeline_mode = #tpu.pipeline_mode<synchronous>, transform_indices = @transform_1, window_bounds = array<i64: 32, 128>}, {pipeline_mode = #tpu.pipeline_mode<synchronous>, transform_indices = @transform_2, window_bounds = array<i64: 128, 128>}, {pipeline_mode = #tpu.pipeline_mode<synchronous>, transform_indices = @transform_3, window_bounds = array<i64: 128, 128>}, {pipeline_mode = #tpu.pipeline_mode<synchronous>, transform_indices = @transform_4, window_bounds = array<i64: 8, 128>}, {transform_indices = @transform_5, window_bounds = array<i64: 8, 128>}]} {
    %c0 = arith.constant 0 : index
    %c0_0 = arith.constant 0 : index
    %0 = vector.load %arg1[%c0, %c0_0] : memref<8x32xf32, #tpu.memory_space<vmem>>, vector<8x32xf32>
    %c0_1 = arith.constant 0 : index
    %c0_2 = arith.constant 0 : index
    %1 = vector.load %arg5[%c0_1, %c0_2] : memref<8x128xf32, #tpu.memory_space<vmem>>, vector<8x128xf32>
    %2 = vector.extract_strided_slice %1 {offsets = [0, 0], sizes = [1, 128], strides = [1, 1]} : vector<8x128xf32> to vector<1x128xf32>
    %3 = vector.extract_strided_slice %1 {offsets = [1, 0], sizes = [1, 128], strides = [1, 1]} : vector<8x128xf32> to vector<1x128xf32>
    %4 = vector.extract_strided_slice %1 {offsets = [2, 0], sizes = [1, 128], strides = [1, 1]} : vector<8x128xf32> to vector<1x128xf32>
    %5 = vector.extract_strided_slice %1 {offsets = [3, 0], sizes = [1, 128], strides = [1, 1]} : vector<8x128xf32> to vector<1x128xf32>
    %6 = vector.extract_strided_slice %1 {offsets = [4, 0], sizes = [1, 128], strides = [1, 1]} : vector<8x128xf32> to vector<1x128xf32>
    %7 = vector.extract_strided_slice %1 {offsets = [5, 0], sizes = [1, 128], strides = [1, 1]} : vector<8x128xf32> to vector<1x128xf32>
    %8 = vector.extract_strided_slice %1 {offsets = [6, 0], sizes = [1, 128], strides = [1, 1]} : vector<8x128xf32> to vector<1x128xf32>
    %c0_3 = arith.constant 0 : index
    %c0_4 = arith.constant 0 : index
    %9 = vector.load %arg2[%c0_3, %c0_4] : memref<32x128xf32, #tpu.memory_space<vmem>>, vector<32x128xf32>
    %cst = arith.constant dense<0.000000e+00> : vector<8x128xf32>
    %10 = tpu.matmul %0, %9, %cst {dimension_numbers = #tpu.dot_dimension_numbers<[1], [0], [0], [1], [0, 0, 1, 1], [], []>} : vector<8x32xf32>, vector<32x128xf32>, vector<8x128xf32> -> vector<8x128xf32>
    %11 = vector.broadcast %2 : vector<1x128xf32> to vector<8x128xf32>
    %12 = arith.addf %10, %11 : vector<8x128xf32>
    %cst_5 = arith.constant dense<0.000000e+00> : vector<8xf32>
    %13 = vector.multi_reduction <add>, %12, %cst_5 [1] : vector<8x128xf32> to vector<8xf32>
    %14 = vector.shape_cast %13 : vector<8xf32> to vector<8x1xf32>
    %cst_6 = arith.constant 1.280000e+02 : f32
    %15 = vector.broadcast %cst_6 : f32 to vector<8x1xf32>
    %16 = arith.divf %14, %15 : vector<8x1xf32>
    %17 = arith.mulf %12, %12 : vector<8x128xf32>
    %cst_7 = arith.constant dense<0.000000e+00> : vector<8xf32>
    %18 = vector.multi_reduction <add>, %17, %cst_7 [1] : vector<8x128xf32> to vector<8xf32>
    %19 = vector.shape_cast %18 : vector<8xf32> to vector<8x1xf32>
    %cst_8 = arith.constant 1.280000e+02 : f32
    %20 = vector.broadcast %cst_8 : f32 to vector<8x1xf32>
    %21 = arith.divf %19, %20 : vector<8x1xf32>
    %22 = vector.broadcast %16 : vector<8x1xf32> to vector<8x128xf32>
    %23 = arith.subf %12, %22 : vector<8x128xf32>
    %24 = arith.mulf %16, %16 : vector<8x1xf32>
    %25 = arith.subf %21, %24 : vector<8x1xf32>
    %cst_9 = arith.constant 9.99999974E-6 : f32
    %26 = vector.broadcast %cst_9 : f32 to vector<8x1xf32>
    %27 = arith.addf %25, %26 : vector<8x1xf32>
    %28 = math.rsqrt %27 : vector<8x1xf32>
    %29 = vector.broadcast %28 : vector<8x1xf32> to vector<8x128xf32>
    %30 = arith.mulf %23, %29 : vector<8x128xf32>
    %31 = vector.broadcast %3 : vector<1x128xf32> to vector<8x128xf32>
    %32 = arith.mulf %30, %31 : vector<8x128xf32>
    %33 = vector.broadcast %4 : vector<1x128xf32> to vector<8x128xf32>
    %34 = arith.addf %32, %33 : vector<8x128xf32>
    %cst_10 = arith.constant 0.000000e+00 : f32
    %35 = vector.broadcast %cst_10 : f32 to vector<8x128xf32>
    %36 = arith.maximumf %34, %35 : vector<8x128xf32>
    %c0_11 = arith.constant 0 : index
    %c0_12 = arith.constant 0 : index
    %37 = vector.load %arg3[%c0_11, %c0_12] : memref<128x128xf32, #tpu.memory_space<vmem>>, vector<128x128xf32>
    %cst_13 = arith.constant dense<0.000000e+00> : vector<8x128xf32>
    %38 = tpu.matmul %36, %37, %cst_13 {dimension_numbers = #tpu.dot_dimension_numbers<[1], [0], [0], [1], [0, 0, 1, 1], [], []>} : vector<8x128xf32>, vector<128x128xf32>, vector<8x128xf32> -> vector<8x128xf32>
    %39 = vector.broadcast %5 : vector<1x128xf32> to vector<8x128xf32>
    %40 = arith.addf %38, %39 : vector<8x128xf32>
    %c0_14 = arith.constant 0 : index
    %c0_15 = arith.constant 0 : index
    %41 = vector.load %arg4[%c0_14, %c0_15] : memref<128x128xf32, #tpu.memory_space<vmem>>, vector<128x128xf32>
    %cst_16 = arith.constant dense<0.000000e+00> : vector<8x128xf32>
    %42 = tpu.matmul %40, %41, %cst_16 {dimension_numbers = #tpu.dot_dimension_numbers<[1], [0], [0], [1], [0, 0, 1, 1], [], []>} : vector<8x128xf32>, vector<128x128xf32>, vector<8x128xf32> -> vector<8x128xf32>
    %43 = vector.broadcast %6 : vector<1x128xf32> to vector<8x128xf32>
    %44 = arith.addf %42, %43 : vector<8x128xf32>
    %45 = arith.addf %36, %44 : vector<8x128xf32>
    %cst_17 = arith.constant dense<0.000000e+00> : vector<8xf32>
    %46 = vector.multi_reduction <add>, %45, %cst_17 [1] : vector<8x128xf32> to vector<8xf32>
    %47 = vector.shape_cast %46 : vector<8xf32> to vector<8x1xf32>
    %cst_18 = arith.constant 1.280000e+02 : f32
    %48 = vector.broadcast %cst_18 : f32 to vector<8x1xf32>
    %49 = arith.divf %47, %48 : vector<8x1xf32>
    %50 = arith.mulf %45, %45 : vector<8x128xf32>
    %cst_19 = arith.constant dense<0.000000e+00> : vector<8xf32>
    %51 = vector.multi_reduction <add>, %50, %cst_19 [1] : vector<8x128xf32> to vector<8xf32>
    %52 = vector.shape_cast %51 : vector<8xf32> to vector<8x1xf32>
    %cst_20 = arith.constant 1.280000e+02 : f32
    %53 = vector.broadcast %cst_20 : f32 to vector<8x1xf32>
    %54 = arith.divf %52, %53 : vector<8x1xf32>
    %55 = vector.broadcast %49 : vector<8x1xf32> to vector<8x128xf32>
    %56 = arith.subf %45, %55 : vector<8x128xf32>
    %57 = arith.mulf %49, %49 : vector<8x1xf32>
    %58 = arith.subf %54, %57 : vector<8x1xf32>
    %cst_21 = arith.constant 9.99999974E-6 : f32
    %59 = vector.broadcast %cst_21 : f32 to vector<8x1xf32>
    %60 = arith.addf %58, %59 : vector<8x1xf32>
    %61 = math.rsqrt %60 : vector<8x1xf32>
    %62 = vector.broadcast %61 : vector<8x1xf32> to vector<8x128xf32>
    %63 = arith.mulf %56, %62 : vector<8x128xf32>
    %64 = vector.broadcast %7 : vector<1x128xf32> to vector<8x128xf32>
    %65 = arith.mulf %63, %64 : vector<8x128xf32>
    %66 = vector.broadcast %8 : vector<1x128xf32> to vector<8x128xf32>
    %67 = arith.addf %65, %66 : vector<8x128xf32>
    %c0_22 = arith.constant 0 : index
    %c0_23 = arith.constant 0 : index
    %68 = vector.load %arg6[%c0_22, %c0_23] : memref<8x128xf32, #tpu.memory_space<vmem>>, vector<8x128xf32>
    tpu.vector_store %arg6[%c0_22, %c0_23], %67 {strides = array<i32>} : memref<8x128xf32, #tpu.memory_space<vmem>>, vector<8x128xf32>,
    return
  }
  func.func @transform_0(%arg0: i32) -> (i32, i32) {
    %c0_i32 = arith.constant 0 : i32
    %c0_i32_0 = arith.constant 0 : i32
    return %arg0, %c0_i32 : i32, i32
  }
  func.func @transform_1(%arg0: i32) -> (i32, i32) {
    %c0_i32 = arith.constant 0 : i32
    %c0_i32_0 = arith.constant 0 : i32
    %c0_i32_1 = arith.constant 0 : i32
    return %c0_i32, %c0_i32_0 : i32, i32
  }
  func.func @transform_2(%arg0: i32) -> (i32, i32) {
    %c0_i32 = arith.constant 0 : i32
    %c0_i32_0 = arith.constant 0 : i32
    %c0_i32_1 = arith.constant 0 : i32
    return %c0_i32, %c0_i32_0 : i32, i32
  }
  func.func @transform_3(%arg0: i32) -> (i32, i32) {
    %c0_i32 = arith.constant 0 : i32
    %c0_i32_0 = arith.constant 0 : i32
    %c0_i32_1 = arith.constant 0 : i32
    return %c0_i32, %c0_i32_0 : i32, i32
  }
  func.func @transform_4(%arg0: i32) -> (i32, i32) {
    %c0_i32 = arith.constant 0 : i32
    %c0_i32_0 = arith.constant 0 : i32
    %c0_i32_1 = arith.constant 0 : i32
    return %c0_i32, %c0_i32_0 : i32, i32
  }
  func.func @transform_5(%arg0: i32) -> (i32, i32) {
    %c0_i32 = arith.constant 0 : i32
    %c0_i32_0 = arith.constant 0 : i32
    return %arg0, %c0_i32 : i32, i32
  }
}

</mosaic_0001>

<bundles_post_ra>
// kernel: tpu_custom_call.1
= control target key start
LH: loop header
LB: loop body
LE: loop exit
PB: predicated region body
PF: predicated region fallthrough
CT: control target
= control target key end

     0   :  { %10 = vsyncpa [#allocation3], 0  ;;  %s1535_s0 = inlined_call_operand.hbm [shape: f32[16,32], index: 0, kind: input, shape index: {}]   ;;  %s1536_s1 = inlined_call_operand.hbm [shape: f32[32,128], index: 1, kind: input, shape index: {}]   ;;  %s1537_s2 = inlined_call_operand.hbm [shape: f32[128,128], index: 2, kind: input, shape index: {}]   ;;  %s1538_s3 = inlined_call_operand.hbm [shape: f32[128,128], index: 3, kind: input, shape index: {}]   ;;  %s1539_s4 = inlined_call_operand.vmem [shape: f32[8,128], index: 4, kind: input, shape index: {}]   ;;  %s1540_s5 = inlined_call_operand.hbm [shape: f32[16,128], index: 5, kind: output, shape index: {}]  }
   0x1   :  { %12 = vsyncpa [#allocation3 + $0x1], 0 }
   0x2   :  { %13 = vsyncpa [#allocation6], 0 }
   0x3   :  { %14 = vsyncpa [#allocation9], 0 }
   0x4   :  { %15 = vsyncpa [#allocation4], 0 }
   0x5   :  { %17 = vsyncpa [#allocation4 + $0x1], 0  ;;  %s1220_s18 = smov 0   ;;  %s1222_s19 = smov 0  }
   0x6   :  { %s1224_s20 = smov 0   ;;  %s1226_s21 = smov 0  }
   0x7 LB: > { %s1241_s22 = sadd.s32 4294967295, %s1178_s21   ;;  %s711_s23 = sadd.s32 4294967294, %s1178_s21   ;;  %s1178_s21 = sphi %s1226_s21, %s1563_s21   ;;  %s1174_s20 = sphi %s1224_s20, %s1562_s20   ;;  %s1170_s19 = sphi %s1222_s19, %s1561_s19   ;;  %s1166_s18 = sphi %s1220_s18, %s1560_s18  }
   0x8   : > { %p43_p0 = scmp.ne.s32.totalorder %s1170_s19, %s1166_s18  ;;  %p1541_p1 = scmp.eq.s32.totalorder %s1241_s22, 0 }
   0x9   : > { %p157_p3 = scmp.eq.s32.totalorder %s711_s23, 1  ;;  %p712_p5 = scmp.ge.s32.totalorder %s1178_s21, 1 }
   0xa   : > { %p1250_p4 = por %p1541_p1, %p43_p0  ;;  %p164_p7 = scmp.lt.s32.totalorder %s1178_s21, 3 }
   0xb   : > { %p1255_p6 = por %p157_p3, %p43_p0  ;;  %s1180_s27 = smov [#allocation5]  }
   0xc   : > { %s1544_s24 = scalar_select %p1250_p4, 1, 0 }
   0xd   : > { %s1545_s25 = scalar_select %p1255_p6, 1, 0 }
   0xe   : > { %p1260_p8 = pnand %p712_p5, %p164_p7  ;;  %s176_s28 = sshll.u32 %s1180_s27, 4  ;;  %s1264_s28 = int_to_ptr.vmem [resolvable:$true] %s176_s28 }
   0xf   : > { %s1181_s30 = smov [#allocation7]   ;;  %s1182_s7 = smov [#allocation8]  }
  0x10   : > { %s1546_s26 = scalar_select %p1260_p8, 1, 0 }
  0x11   : > { %p920_p9 = pneg %p1260_p8  ;;  %s189_s6 = sshll.u32 %s1181_s30, 4  ;;  %s1275_s6 = int_to_ptr.vmem [resolvable:$true] %s189_s6 }
  0x12   : > { %s1277_s8 = sshll.u32 %s1182_s7, 4  ;;  %s990_s11 = scalar_lea.hbm %s1536_s1, 512  ;;  %s203_s8 = int_to_ptr.vmem [resolvable:$true] %s1277_s8 }
  0x13   : > { %p1271_p11 = pnand %p920_p9, %p1541_p1  ;;  %p991_p12 = scmp.ne.s32.totalorder %s1536_s1, %s990_s11 }
  0x14   : > { %p997_p5 = scmp.lt.u32.totalorder %s990_s11, %s1536_s1 }
  0x15   : > { %p1287_p13 = pneg %p1271_p11 }
  0x17   : > { %p993_p0 = pnand %p1287_p13, %p991_p12 }
  0x19   : > { %p994_p3 = pneg %p993_p0 }
  0x1b   : > { %p999_p7 = pnand %p997_p5, %p994_p3 }
  0x1d   : > { %1002 = shalt.err (!%p999_p7)
}
  0x1e   : > { %s1003_s17 = scalar_lea.vmem %s1264_s28, 512  ;;  %p1011_p2 = scmp.lt.s32.totalorder %s1264_s28, %s1264_s28 }
  0x1f   : > { %p1004_p9 = scmp.ne.s32.totalorder %s1264_s28, %s1003_s17  ;;  %p1012_p6 = scmp.lt.s32.totalorder %s1003_s17, %s1003_s17 }
  0x21   : > { %p1006_p10 = pnand %p1004_p9, %p1287_p13  ;;  %p1013_p12 = por %p1012_p6, %p1011_p2 }
  0x23   : > { %p1007_p1 = pneg %p1006_p10 }
  0x25   : > { %p1014_p0 = pnand %p1013_p12, %p1007_p1 }
  0x27   : > { %1017 = shalt.err (!%p1014_p0)
}
  0x28   : > { %s1183_s23 = smov 128   ;;  %s1184_s27 = smov 8  }
  0x29   : > { %923 = dma.hbm_to_vmem [thread:$0]  (!%p1271_p11), %s1536_s1, 512, %s1264_s28, [#allocation6], %s1183_s23, %s1183_s23, %s1184_s27  }
  0x2a   : > { %s1018_s11 = scalar_lea.hbm %s1537_s2, 2048 }
  0x2b   : > { %p1019_p1 = scmp.ne.s32.totalorder %s1537_s2, %s1018_s11  ;;  %p1025_p10 = scmp.lt.u32.totalorder %s1018_s11, %s1537_s2 }
  0x2d   : > { %p1021_p2 = pnand %p1019_p1, %p1287_p13 }
  0x2f   : > { %p1022_p6 = pneg %p1021_p2 }
  0x31   : > { %p1027_p3 = pnand %p1025_p10, %p1022_p6 }
  0x33   : > { %1030 = shalt.err (!%p1027_p3)
}
  0x34   : > { %s1031_s28 = scalar_lea.vmem %s1275_s6, 2048  ;;  %p1039_p12 = scmp.lt.s32.totalorder %s1275_s6, %s1275_s6 }
  0x35   : > { %p1032_p5 = scmp.ne.s32.totalorder %s1275_s6, %s1031_s28  ;;  %p1040_p0 = scmp.lt.s32.totalorder %s1031_s28, %s1031_s28 }
  0x37   : > { %p1034_p7 = pnand %p1032_p5, %p1287_p13  ;;  %p1041_p1 = por %p1040_p0, %p1039_p12 }
  0x39   : > { %p1035_p9 = pneg %p1034_p7 }
  0x3b   : > { %p1042_p2 = pnand %p1041_p1, %p1035_p9 }
  0x3d   : > { %1045 = shalt.err (!%p1042_p2)
}
  0x3e   : > { %926 = dma.hbm_to_vmem [thread:$0]  (!%p1271_p11), %s1537_s2, 2048, %s1275_s6, [#allocation6], %s1183_s23, %s1183_s23, %s1184_s27  }
  0x3f   : > { %s1046_s10 = scalar_lea.hbm %s1538_s3, 2048 }
  0x40   : > { %p1047_p6 = scmp.ne.s32.totalorder %s1538_s3, %s1046_s10  ;;  %p1053_p5 = scmp.lt.u32.totalorder %s1046_s10, %s1538_s3 }
  0x42   : > { %p1049_p10 = pnand %p1047_p6, %p1287_p13 }
  0x44   : > { %p1050_p3 = pneg %p1049_p10 }
  0x46   : > { %p1055_p7 = pnand %p1053_p5, %p1050_p3 }
  0x48   : > { %1058 = shalt.err (!%p1055_p7)
}
  0x49   : > { %s1059_s16 = scalar_lea.vmem %s203_s8, 2048  ;;  %p1067_p1 = scmp.lt.s32.totalorder %s203_s8, %s203_s8 }
  0x4a   : > { %p1060_p9 = scmp.ne.s32.totalorder %s203_s8, %s1059_s16  ;;  %p1068_p2 = scmp.lt.s32.totalorder %s1059_s16, %s1059_s16 }
  0x4c   : > { %p1062_p12 = pnand %p1060_p9, %p1287_p13  ;;  %p1069_p4 = por %p1068_p2, %p1067_p1 }
  0x4e   : > { %p1063_p0 = pneg %p1062_p12 }
  0x50   : > { %p1070_p8 = pnand %p1069_p4, %p1063_p0 }
  0x52   : > { %1073 = shalt.err (!%p1070_p8)
}
  0x53   : > { %929 = dma.hbm_to_vmem [thread:$0]  (!%p1271_p11), %s1538_s3, 2048, %s203_s8, [#allocation9], %s1183_s23, %s1183_s23, %s1184_s27  }
  0x54   : > { %s1360_s14 = sadd.s32 1, %s1178_s21   ;;  %s30_s17 = sadd.s32 1, %s1174_s20 }
  0x55   : > { %s27_s29 = ssub.s32 %s1178_s21, %s1360_s14  ;;  %p37_p8 = scmp.ne.s32.totalorder %s1174_s20, %s1170_s19 }
  0x56   : > { %p28_p4 = scmp.eq.s32.totalorder %s27_s29, 0  ;;  %p38_p13 = scmp.eq.s32.totalorder %s1178_s21, 0 }
  0x57   : > { %p941_p6 = scmp.lt.s32.totalorder %s1178_s21, 2  ;;  %p1549_p3 = scmp.eq.s32.totalorder %s1241_s22, 1 }
  0x58   : > { %s1370_s30 = scalar_select %p28_p4, %s1174_s20, %s30_s17  }
  0x59   : > { %p39_p10 = por %p38_p13, %p37_p8  ;;  %p1374_p5 = por %p1549_p3, %p37_p8 }
  0x5a   : > { %s219_s9 = sand.u32 1, %s1174_s20   ;;  %s718_s10 = sshll.u32 %s1178_s21, 7 }
  0x5b   : > { %s717_s8 = sshll.u32 %s219_s9, 3  ;;  %s1383_s11 = scalar_lea.hbm %s1535_s0, %s718_s10 }
  0x5c   : > { %s223_s12 = scalar_lea.vmem [#allocation2], %s717_s8  ;;  %p1385_p11 = pnand %p941_p6, %p39_p10 }
  0x5d   : > { %s230_s13 = sshll.u32 %s223_s12, 4  ;;  %s220_s16 = scalar_lea.sflag [#allocation3], %s219_s9  ;;  %s1389_s13 = int_to_ptr.vmem [resolvable:$true] %s230_s13 }
  0x5e   : > { %s1074_s6 = scalar_lea.hbm %s1383_s11, 128  ;;  %p1076_p9 = pneg %p1385_p11 }
  0x5f   : > { %p1075_p7 = scmp.ne.s32.totalorder %s1383_s11, %s1074_s6  ;;  %s1079_s17 = scalar_lea.hbm %s1535_s0, 256 }
  0x60   : > { %p1080_p1 = scmp.lt.u32.totalorder %s1383_s11, %s1535_s0  ;;  %p1081_p2 = scmp.lt.u32.totalorder %s1079_s17, %s1074_s6 }
  0x61   : > { %p1077_p12 = pnand %p1076_p9, %p1075_p7  ;;  %p1083_p8 = scmp.lt.u32.totalorder %s1074_s6, %s1383_s11 }
  0x62   : > { %p1082_p4 = por %p1081_p2, %p1080_p1 }
  0x63   : > { %p1078_p0 = pneg %p1077_p12 }
  0x64   : > { %p1084_p13 = por %p1083_p8, %p1082_p4 }
  0x66   : > { %p1085_p6 = pnand %p1084_p13, %p1078_p0 }
  0x68   : > { %1088 = shalt.err (!%p1085_p6)
}
  0x69   : > { %s1089_s9 = scalar_lea.vmem %s1389_s13, 128  ;;  %s1185_s23 = smov [#allocation2]  }
  0x6a   : > { %p1090_p10 = scmp.ne.s32.totalorder %s1389_s13, %s1089_s9  ;;  %s1094_s27 = sshll.u32 %s1185_s23, 4  ;;  %s1095_s27 = int_to_ptr.vmem [resolvable:$false] %s1094_s27 }
  0x6b   : > { %s1096_s12 = scalar_lea.vmem %s1095_s27, 256  ;;  %p1097_p12 = scmp.lt.s32.totalorder %s1389_s13, %s1095_s27 }
  0x6c   : > { %p1092_p3 = pnand %p1090_p10, %p1076_p9  ;;  %p1098_p1 = scmp.lt.s32.totalorder %s1096_s12, %s1089_s9 }
  0x6e   : > { %p1093_p7 = pneg %p1092_p3  ;;  %p1099_p2 = por %p1098_p1, %p1097_p12 }
  0x70   : > { %p1100_p4 = pnand %p1099_p2, %p1093_p7 }
  0x72   : > { %1103 = shalt.err (!%p1100_p4)
}
  0x73   : > { %933 = dma.hbm_to_vmem [thread:$0]  (!%p1385_p11), %s1383_s11, 128, %s1389_s13, %s220_s16  }
  0x74   : > { %p1552_p0 = scmp.ne.s32.totalorder %s1546_s26, 0 }
  0x75   : > { %s1419_s6 = sand.u32 (!%p1552_p0), 1, %s1170_s19   ;;  %p1553_p9 = scmp.ne.s32.totalorder (!%p1552_p0), %s1544_s24, 0 }
  0x76   : > { %239 = sbr.rel (%p1552_p0) target bundleno = 1142 (0x476), region = 40  ;;  %s720_s28 = sshll.u32 (!%p1552_p0), %s1419_s6, 3 }
  0x77   : > { %s242_s29 = scalar_lea.sflag (!%p1552_p0), [#allocation3], %s1419_s6  ;;  %s245_s17 = scalar_lea.vmem (!%p1552_p0), [#allocation2], %s720_s28 }
  0x7d   : > { %1149 = dma.done.wait (%p1553_p9), %s242_s29, 128  }
  0x7e   : > { %1151 = vsyncadd (%p1553_p9), %s242_s29, 4294967168  ;;  %p1554_p11 = scmp.eq.s32.totalorder %s1241_s22, 0 }
  0x80   : > { %1153 = dma.done.wait (%p1554_p11), [#allocation6], 2560   ;;  %p1555_p8 = pmov %p1554_p11 }
  0x82   : > { %1155 = vsyncadd (%p1555_p8), [#allocation6], 4294964736  ;;  %p1556_p13 = pmov %p1555_p8 }
  0x83   : > { %p1557_p6 = pmov %p1555_p8 }
  0x84   : > { %1157 = dma.done.wait (%p1556_p13), [#allocation9], 2048  }
  0x85   : > { %1159 = vsyncadd (%p1557_p6), [#allocation9], 4294965248  ;;  %v1186_v0 = vmov 0.0|0.0   ;;  %vm1187_vm0 = vmmov 0   ;;  %v1188_v1 = vmov 0.0   ;;  %v286_v2 = vld [vmem:[#allocation5] sm:$0xff]  ;;  %v290_v12 = vlaneseq }
  0x86   : > { %850 = vmatprep.subr.bf16.mxu0 %v1186_v0  ;;  %777 = vmatprep.mubr.msk.f32.mxu0 %vm1187_vm0, %v1188_v1  ;;  %v287_v3 = vld [vmem:[#allocation5 + $0x8] sm:$0xff]  ;;  %v288_v4 = vld [vmem:[#allocation5 + $0x10] sm:$0xff]  ;;  %v289_v6 = vld [vmem:[#allocation5 + $0x18] sm:$0xff]  ;;  %vm294_vm1 = vcmask 261120   ;;  %s727_s11 = sshll.u32 %s1241_s22, 7  ;;  %s283_s13 = scalar_lea.vmem [#allocation10], %s720_s28 }
  0x87   : > { %856 = vmatprep.subr.bf16.mxu1 %v1186_v0  ;;  %812 = vmatprep.mubr.msk.f32.mxu1 %vm1187_vm0, %v1188_v1  ;;  %v851_v5 = vpack.c.bf16 %v287_v3, %v286_v2  ;;  %v854_v7 = vpack.c.bf16 %v289_v6, %v288_v4  ;;  %v284_v8 = vld [vmem:[%s245_s17] sm:$0xff]  ;;  %v393_v9 = vld [vmem:[#allocation7] sm:$0xff]  ;;  %v394_v10 = vld [vmem:[#allocation7 + $0x8] sm:$0xff]  ;;  %v1445_v13 = vshrl.u32 %v290_v12, 7  ;;  %s612_s15 = sshll.u32 %s283_s13, 4  ;;  %s1491_s8 = scalar_lea.hbm %s1540_s5, %s727_s11  ;;  %s1493_s15 = int_to_ptr.vmem [resolvable:$true] %s612_s15 }
  0x88   : > { %v857_v11 = vpack.c.bf16 %v394_v10, %v393_v9  ;;  %v1451_v15 = vld [vmem:[%s1539_s4] sm:$0xff]  ;;  %v396_v22 = vld [vmem:[#allocation7 + $0x18] sm:$0xff]  ;;  %v397_v24 = vld [vmem:[#allocation7 + $0x20] sm:$0xff]  ;;  %s599_s9 = scalar_lea.sflag [#allocation4], %s1419_s6  ;;  %s1104_s23 = scalar_lea.vmem %s1493_s15, 128 }
  0x89   : > { %852 = vmatpush3.bf16.msra.mxu0 %v851_v5  ;;  %v292_v14 = vsub.s32 0, %v1445_v13  ;;  %v395_v21 = vld [vmem:[#allocation7 + $0x10] sm:$0xff]  ;;  %v398_v25 = vld [vmem:[#allocation7 + $0x28] sm:$0xff]  ;;  %v400_v28 = vld [vmem:[#allocation7 + $0x38] sm:$0xff]  ;;  %p1105_p10 = scmp.ne.s32.totalorder %s1493_s15, %s1104_s23  ;;  %s1189_s22 = smov [#allocation10]  }
  0x8a   : > { %853 = vmatprep.subr.bf16.mxu0 %v1186_v0  ;;  %858 = vmatpush3.bf16.msra.mxu1 %v857_v11  ;;  %v860_v23 = vpack.c.bf16 %v396_v22, %v395_v21  ;;  %v863_v26 = vpack.c.bf16 %v398_v25, %v397_v24  ;;  %v399_v27 = vld [vmem:[#allocation7 + $0x30] sm:$0xff]  ;;  %v401_v30 = vld [vmem:[#allocation7 + $0x40] sm:$0xff]  ;;  %v402_v31 = vld [vmem:[#allocation7 + $0x48] sm:$0xff]  ;;  %v411_v22 = vsub.s32 3, %v1445_v13  ;;  %s1108_s27 = sshll.u32 %s1189_s22, 4  ;;  %s1109_s27 = int_to_ptr.vmem [resolvable:$false] %s1108_s27 }
  0x8b   : > { %859 = vmatprep.subr.bf16.mxu1 %v1186_v0  ;;  %v293_v16 = vrot.slane %v1451_v15, %v292_v14  ;;  %v866_v29 = vpack.c.bf16 %v400_v28, %v399_v27  ;;  %v869_v32 = vpack.c.bf16 %v402_v31, %v401_v30  ;;  %v403_v33 = vld [vmem:[#allocation7 + $0x50] sm:$0xff]  ;;  %v404_v34 = vld [vmem:[#allocation7 + $0x58] sm:$0xff]  ;;  %v405_v36 = vld [vmem:[#allocation7 + $0x60] sm:$0xff]  ;;  %p1106_p3 = pnand %p1105_p10, %p1374_p5  ;;  %s1110_s12 = scalar_lea.vmem %s1109_s27, 256 }
  0x8c   : > { %v872_v35 = vpack.c.bf16 %v404_v34, %v403_v33  ;;  %v406_v37 = vld [vmem:[#allocation7 + $0x68] sm:$0xff]  ;;  %v407_v39 = vld [vmem:[#allocation7 + $0x70] sm:$0xff]  ;;  %v408_v40 = vld [vmem:[#allocation7 + $0x78] sm:$0xff]  ;;  %p1111_p12 = scmp.lt.s32.totalorder %s1493_s15, %s1109_s27  ;;  %p1112_p1 = scmp.lt.s32.totalorder %s1110_s12, %s1104_s23 }
  0x8d   : > { %855 = vmatpush3.bf16.msra.mxu0 %v854_v7  ;;  %v875_v38 = vpack.c.bf16 %v406_v37, %v405_v36  ;;  %v878_v41 = vpack.c.bf16 %v408_v40, %v407_v39  ;;  %v483_v42 = vld [vmem:[#allocation8] sm:$0xff]  ;;  %v484_v43 = vld [vmem:[#allocation8 + $0x8] sm:$0xff]  ;;  %v485_v44 = vld [vmem:[#allocation8 + $0x10] sm:$0xff]  ;;  %v384_v7 = vsub.s32 1, %v1445_v13  ;;  %v589_v40 = vsub.s32 5, %v1445_v13  ;;  %p1107_p7 = pneg %p1106_p3 }
  0x8e   : > { %880 = vmatprep.subr.bf16.mxu0 %v1186_v0  ;;  %861 = vmatpush3.bf16.msra.mxu1 %v860_v23  ;;  %v881_v45 = vpack.c.bf16 %v484_v43, %v483_v42  ;;  %v486_v46 = vld [vmem:[#allocation8 + $0x18] sm:$0xff]  ;;  %v487_v48 = vld [vmem:[#allocation8 + $0x20] sm:$0xff]  ;;  %v488_v49 = vld [vmem:[#allocation8 + $0x28] sm:$0xff]  ;;  %v412_v23 = vrot.slane %v1451_v15, %v411_v22  ;;  %p1113_p2 = por %p1112_p1, %p1111_p12 }
  0x8f   : > { %862 = vmatprep.subr.bf16.mxu1 %v1186_v0  ;;  %v884_v47 = vpack.c.bf16 %v486_v46, %v485_v44  ;;  %v887_v50 = vpack.c.bf16 %v488_v49, %v487_v48  ;;  %v489_v51 = vld [vmem:[#allocation8 + $0x30] sm:$0xff]  ;;  %v490_v52 = vld [vmem:[#allocation8 + $0x38] sm:$0xff]  ;;  %v491_v54 = vld [vmem:[#allocation8 + $0x40] sm:$0xff]  ;;  %v385_v10 = vrot.slane %v1451_v15, %v384_v7  ;;  %v590_v43 = vrot.slane %v1451_v15, %v589_v40 }
  0x90   : > { %778 = vmatmul.mubr.msk.f32.vlgmr.msra.gmra.mrb[0].mxu0 %vm294_vm1, %v284_v8  ;;  %v890_v53 = vpack.c.bf16 %v490_v52, %v489_v51  ;;  %v492_v55 = vld [vmem:[#allocation8 + $0x48] sm:$0xff]  ;;  %v493_v57 = vld [vmem:[#allocation8 + $0x50] sm:$0xff]  ;;  %v494_v58 = vld [vmem:[#allocation8 + $0x58] sm:$0xff]  ;;  %v389_v8 = vsub.s32 2, %v1445_v13  ;;  %p1114_p4 = pnand %p1113_p2, %p1107_p7 }
  0x91   : > { %847 = vmatprep.mubr.msk.f32.mxu0 %vm1187_vm0, %v1188_v1  ;;  %882 = vmatpush3.bf16.msra.mxu0 %v881_v45  ;;  %v893_v56 = vpack.c.bf16 %v492_v55, %v491_v54  ;;  %v896_v59 = vpack.c.bf16 %v494_v58, %v493_v57  ;;  %v495_v60 = vld [vmem:[#allocation8 + $0x60] sm:$0xff]  ;;  %v496_v61 = vld [vmem:[#allocation8 + $0x68] sm:$0xff] }
  0x92   : > { %864 = vmatpush3.bf16.msra.mxu1 %v863_v26  ;;  %883 = vmatprep.subr.bf16.mxu0 %v1186_v0  ;;  %v899_v62 = vpack.c.bf16 %v496_v61, %v495_v60  ;;  %v501_v26 = vsub.s32 4, %v1445_v13 }
  0x93   : > { %865 = vmatprep.subr.bf16.mxu1 %v1186_v0 }
  0x94   : > { %v502_v27 = vrot.slane %v1451_v15, %v501_v26 }
  0x95   : > { %885 = vmatpush3.bf16.msra.mxu0 %v884_v47 }
  0x96   : > { %867 = vmatpush3.bf16.msra.mxu1 %v866_v29  ;;  %886 = vmatprep.subr.bf16.mxu0 %v1186_v0 }
  0x97   : > { %868 = vmatprep.subr.bf16.mxu1 %v1186_v0 }
  0x99   : > { %888 = vmatpush3.bf16.msra.mxu0 %v887_v50 }
  0x9a   : > { %870 = vmatpush3.bf16.msra.mxu1 %v869_v32  ;;  %889 = vmatprep.subr.bf16.mxu0 %v1186_v0 }
  0x9b   : > { %871 = vmatprep.subr.bf16.mxu1 %v1186_v0 }
  0x9d   : > { %891 = vmatpush3.bf16.msra.mxu0 %v890_v53 }
  0x9e   : > { %873 = vmatpush3.bf16.msra.mxu1 %v872_v35  ;;  %892 = vmatprep.subr.bf16.mxu0 %v1186_v0 }
  0x9f   : > { %874 = vmatprep.subr.bf16.mxu1 %v1186_v0 }
  0xa1   : > { %894 = vmatpush3.bf16.msra.mxu0 %v893_v56 }
  0xa2   : > { %876 = vmatpush3.bf16.msra.mxu1 %v875_v38  ;;  %895 = vmatprep.subr.bf16.mxu0 %v1186_v0 }
  0xa3   : > { %877 = vmatprep.subr.bf16.mxu1 %v1186_v0 }
  0xa5   : > { %897 = vmatpush3.bf16.msra.mxu0 %v896_v59 }
  0xa6   : > { %879 = vmatpush3.bf16.msra.mxu1 %v878_v41  ;;  %898 = vmatprep.subr.bf16.mxu0 %v1186_v0  ;;  %v594_v41 = vsub.s32 6, %v1445_v13 }
  0xa8   : > { %v595_v46 = vrot.slane %v1451_v15, %v594_v41 }
  0xa9   : > { %900 = vmatpush3.bf16.msra.mxu0 %v899_v62 }
  0xaa   : > { %901 = vmatprep.subr.bf16.mxu0 %v1186_v0  ;;  %v390_v0 = vrot.slane %v1451_v15, %v389_v8 }
 0x163   : > { %v364_v17 = vpop.f32.mrb[0].mxu0 }
 0x164   : > { %v1454_v18 = vadd.f32 %v364_v17, %v293_v16  ;;  %v779_v19 = vpop.f32.mrb[1].mxu0 }
 0x165   : > { %v497_v19 = vld [vmem:[#allocation8 + $0x70] sm:$0xff] }
 0x166   : > { %368 = vadd.xlane.f32.xlu0 %v1454_v18  ;;  %v372_v20 = vmul.f32 %v1454_v18, %v1454_v18 }
 0x16a   : > { %373 = vadd.xlane.f32.xlu0 %v372_v20  ;;  %v498_v20 = vld [vmem:[#allocation8 + $0x78] sm:$0xff] }
 0x16b   : > { %v902_v21 = vpack.c.bf16 %v498_v20, %v497_v19 }
 0x16d   : > { %903 = vmatpush3.bf16.msra.mxu0 %v902_v21 }
 0x1f3   : > { %v369_v63 = vpop.xlane.xlu0 %368 }
 0x1f4   : > { %v371_v1 = vmul.f32 0.0078125, %v369_v63 }
 0x1f6   : > { %v377_v3 = vmul.f32 %v371_v1, %v371_v1  ;;  %v376_v9 = vsub.f32 %v1454_v18, %v371_v1 }
 0x1f7   : > { %v374_v2 = vpop.xlane.xlu0 %373 }
 0x1f8   : > { %v375_v4 = vmul.f32 0.0078125, %v374_v2 }
 0x1fa   : > { %v378_v5 = vsub.f32 %v375_v4, %v377_v3 }
 0x1fc   : > { %v379_v6 = vadd.f32 1e-05, %v378_v5 }
 0x1fe   : > { %986 = vrsqrt.f32 %v379_v6 }
 0x208   : > { %v987_v11 = vpop.eup %986 }
 0x209   : > { %v381_v12 = vmul.f32 %v987_v11, %v376_v9 }
 0x20b   : > { %v386_v14 = vmul.f32 %v385_v10, %v381_v12 }
 0x20d   : > { %v391_v16 = vadd.f32 %v390_v0, %v386_v14 }
 0x20f   : > { %v392_v17 = vmax.f32 %v391_v16, 0.0 }
 0x211   : > { %813 = vmatmul.mubr.f32.vlgmr.msra.gmra.mrb[0].mxu1 %v392_v17 }
 0x2e4   : > { %v479_v24 = vpop.f32.mrb[0].mxu1 }
 0x2e5   : > { %v480_v18 = vadd.f32 %v479_v24, %v412_v23  ;;  %v814_v25 = vpop.f32.mrb[1].mxu1 }
 0x2e7   : > { %848 = vmatmul.mubr.f32.vlgmr.msra.gmra.mrb[2].mxu0 %v480_v18 }
 0x3ba   : > { %v569_v28 = vpop.f32.mrb[2].mxu0 }
 0x3bb   : > { %v570_v29 = vadd.f32 %v569_v28, %v502_v27  ;;  %v849_v30 = vpop.f32.mrb[3].mxu0 }
 0x3bd   : > { %v573_v31 = vadd.f32 %v570_v29, %v392_v17 }
 0x3bf   : > { %574 = vadd.xlane.f32.xlu1 %v573_v31  ;;  %v577_v32 = vmul.f32 %v573_v31, %v573_v31 }
 0x3c3   : > { %578 = vadd.xlane.f32.xlu1 %v577_v32 }
 0x44c   : > { %v575_v33 = vpop.xlane.xlu1 %574 }
 0x44d   : > { %v576_v34 = vmul.f32 0.0078125, %v575_v33 }
 0x44f   : > { %v582_v36 = vmul.f32 %v576_v34, %v576_v34  ;;  %v581_v42 = vsub.f32 %v573_v31, %v576_v34 }
 0x450   : > { %v579_v35 = vpop.xlane.xlu1 %578 }
 0x451   : > { %v580_v37 = vmul.f32 0.0078125, %v579_v35 }
 0x453   : > { %v583_v38 = vsub.f32 %v580_v37, %v582_v36 }
 0x455   : > { %v584_v39 = vadd.f32 1e-05, %v583_v38 }
 0x457   : > { %988 = vrsqrt.f32 %v584_v39 }
 0x461   : > { %v989_v44 = vpop.eup %988 }
 0x462   : > { %v586_v45 = vmul.f32 %v989_v44, %v581_v42 }
 0x464   : > { %v591_v47 = vmul.f32 %v590_v43, %v586_v45 }
 0x466   : > { %v596_v48 = vadd.f32 %v595_v46, %v591_v47 }
 0x468   : > { %597 = vst [vmem:[%s283_s13] sm:$0xff] %v596_v48 }
 0x469   : > { %1117 = shalt.err (!%p1114_p4)
}
 0x46a   : > { %s1118_s6 = scalar_lea.hbm %s1491_s8, 128  ;;  %s1122_s17 = scalar_lea.hbm %s1540_s5, 256 }
 0x46b   : > { %p1119_p0 = scmp.ne.s32.totalorder %s1491_s8, %s1118_s6  ;;  %p1123_p8 = scmp.lt.u32.totalorder %s1491_s8, %s1540_s5 }
 0x46c   : > { %p1124_p13 = scmp.lt.u32.totalorder %s1122_s17, %s1118_s6  ;;  %p1126_p10 = scmp.lt.u32.totalorder %s1118_s6, %s1491_s8 }
 0x46d   : > { %p1120_p9 = pnand %p1119_p0, %p1374_p5 }
 0x46e   : > { %p1125_p6 = por %p1124_p13, %p1123_p8 }
 0x46f   : > { %p1121_p11 = pneg %p1120_p9 }
 0x470   : > { %p1127_p3 = por %p1126_p10, %p1125_p6 }
 0x472   : > { %p1128_p7 = pnand %p1127_p3, %p1121_p11 }
 0x474   : > { %1131 = shalt.err (!%p1128_p7)
}
 0x475   : > { %918 = dma.vmem_to_hbm [thread:$0]  (%p1374_p5), %s1493_s15, 128, %s1491_s8, %s599_s9  }
 0x476 PF: > { %s624_s11 = sand.u32 1, %s1166_s18   ;;  %p1558_p12 = scmp.ne.s32.totalorder %s1545_s25, 0 }
 0x477   : > { %p1559_p1 = scmp.ge.s32.totalorder %s1178_s21, 2  ;;  %s625_s13 = scalar_lea.sflag [#allocation4], %s624_s11 }
 0x479   : > { %p935_p2 = pnand %p1559_p1, %p1558_p12 }
 0x47b   : > { %1161 = dma.done.wait (!%p935_p2), %s625_s13, 128  }
 0x47c   : > { %1163 = vsyncadd (!%p935_p2), %s625_s13, 4294967168  ;;  %p20_p4 = scmp.ge.s32.totalorder %s1360_s14, 4   ;;  %s1560_s18 = smov %s1170_s19 }
 0x47d   : > { %s1561_s19 = smov %s1174_s20  ;;  %s1562_s20 = smov %s1370_s30 }
 0x47e   : > { %s1563_s21 = smov %s1360_s14  ;;  %22 = sbr.rel (!%p20_p4) target bundleno = 7 (0x7), region = 97 }
 0x485   :  { %630 = vsyncpa [#allocation3], 1 }
 0x486   :  { %632 = vsyncpa [#allocation3 + $0x1], 1 }
 0x487   :  { %633 = vsyncpa [#allocation6], 1 }
 0x488   :  { %634 = vsyncpa [#allocation9], 1 }
 0x489   :  { %635 = vsyncpa [#allocation4], 1 }
 0x48a   :  { %637 = vsyncpa [#allocation4 + $0x1], 1 }

</bundles_post_ra>
